<compile_context>
chip_gen: v6e
topology: v6e:2x2x1
jax: 0.10.0
libtpu: 0.0.40
codegen_flags: <defaults>
</compile_context>

<pallas_src>
import jax
import jax.numpy as jnp
from jax.experimental import pallas as pl
from jax.experimental.pallas import tpu as pltpu


# ---------------------------------------------------------------------------
# Small helpers
# ---------------------------------------------------------------------------
def _round_up(x, m):
    return ((x + m - 1) // m) * m


def _cdiv(a, b):
    return -(-a // b)


# ---------------------------------------------------------------------------
# In-kernel building blocks
# ---------------------------------------------------------------------------
def _dense(h, w_ref, b_ref, relu):
    """y = h @ W + b with f32 accumulation on the MXU; bias/ReLU kept in f32."""
    w = w_ref[...]
    y = jnp.dot(h.astype(w.dtype), w, preferred_element_type=jnp.float32)
    y = y + b_ref[...].astype(jnp.float32)
    return jnp.maximum(y, 0.0) if relu else y


def _mlp_slab(x, wb_refs):
    """Run the fused (f | g) MLP: ReLU on all layers except the last."""
    n = len(wb_refs) // 2
    h = x
    for l in range(n):
        h = _dense(h, wb_refs[2 * l], wb_refs[2 * l + 1], relu=(l < n - 1))
    return h


def _fg_kernel(x_ref, *refs):
    """Fused (f | g) MLP -> one lane-dense [B, round_up(S+S*A,128)] slab."""
    *wb, o_ref = refs
    h = x_ref[...].astype(jnp.float32)
    o_ref[...] = _mlp_slab(h, wb).astype(o_ref.dtype)


def _make_dyn_kernel(S, A, dt, out_width):
    """Fused kernel: f/g MLPs + gu + x_dot + next_state -> one [B, out_width] slab.

    The packed layer-4 g columns are a-major (column a*S + s holds g[b, s, a]),
    so gu is an unrolled loop of A contiguous VPU multiply-adds.
    """

    def kernel(x_ref, act_ref, *refs):
        *wb, o_ref = refs
        x = x_ref[...].astype(jnp.float32)
        fg = _mlp_slab(x, wb)                  # [B, fg_width]; g stored a-major
        f = fg[:, :S]                          # [B, S]
        act = act_ref[...].astype(jnp.float32)  # [B, A]

        gu = jnp.zeros_like(f)
        for a in range(A):                     # static unroll; contiguous FMAs
            gu = gu + fg[:, S + a * S:S + (a + 1) * S] * act[:, a:a + 1]

        x_dot = f + gu
        nxt = x_dot * dt + x

        pieces = [x_dot, nxt]
        pad = out_width - 2 * S
        if pad:
            pieces.append(jnp.zeros((x_dot.shape[0], pad), jnp.float32))
        o_ref[...] = jnp.concatenate(pieces, axis=1).astype(o_ref.dtype)

    return kernel


# ---------------------------------------------------------------------------
# pallas_call wrapper
# ---------------------------------------------------------------------------
def _pick_batch_block(batch, max_block):
    """Largest block <= max_block; keep >= 2 grid steps for non-trivial
    single-block batches so v7x megacore can shard rows across both TCs."""
    bb = min(max_block, _round_up(batch, 8))
    if 16 < batch <= bb:
        bb = max(8, _round_up(_cdiv(batch, 2), 8))
    return bb


def _fused_call(kernel, batched_inputs, weights, out_width, out_dtype,
                batch_block):
    """Run `kernel` over a 1-D "parallel" batch grid.

    Weights use index_map -> (0, 0) so they stay VMEM-resident across grid
    steps.  Ragged batches are zero-padded to a multiple of the block and the
    output is sliced back afterwards (no gridless fallback).
    """
    batch = batched_inputs[0].shape[0]
    bb = _pick_batch_block(batch, batch_block)
    padded = _round_up(batch, bb)
    grid = (padded // bb,)
    if padded != batch:
        batched_inputs = [jnp.pad(x, ((0, padded - batch), (0, 0)))
                          for x in batched_inputs]

    flops = 2 * padded * sum(int(w.shape[0]) * int(w.shape[1])
                             for w in weights[0::2])
    bytes_accessed = (
        sum(int(x.size) * x.dtype.itemsize
            for x in (*batched_inputs, *weights))
        + padded * out_width * jnp.dtype(out_dtype).itemsize)
    cost = pl.CostEstimate(flops=flops, transcendentals=0,
                           bytes_accessed=bytes_accessed)

    in_specs = (
        [pl.BlockSpec((bb, x.shape[1]), lambda i: (i, 0))
         for x in batched_inputs]
        + [pl.BlockSpec(w.shape, lambda i: (0, 0)) for w in weights])
    out_specs = pl.BlockSpec((bb, out_width), lambda i: (i, 0))

    slab = pl.pallas_call(
        kernel,
        out_shape=jax.ShapeDtypeStruct((padded, out_width), out_dtype),
        grid=grid,
        in_specs=in_specs,
        out_specs=out_specs,
        compiler_params=pltpu.CompilerParams(
            dimension_semantics=("parallel",)),
        cost_estimate=cost,
    )(*batched_inputs, *weights)

    return slab[:batch] if padded != batch else slab


def fused_fg_forward(state, packed_fwd, S, A, fg_width, batch_block=512):
    """Returns (f(state), g(state)) from one fused pallas_call."""
    slab = _fused_call(_fg_kernel, [state], packed_fwd, fg_width,
                       state.dtype, batch_block)
    return slab[:, :S], slab[:, S:S + S * A]


def fused_dynamics(state, action, packed_dyn, S, A, dt, dyn_width,
                   batch_block=512):
    """Returns (x_dot, next_state) from one fused pallas_call."""
    kernel = _make_dyn_kernel(S, A, dt, dyn_width)
    slab = _fused_call(kernel, [state, action], packed_dyn, dyn_width,
                       state.dtype, batch_block)
    return slab[:, :S], slab[:, S:2 * S]


# ---------------------------------------------------------------------------
# Parameter construction & packing
# ---------------------------------------------------------------------------
def init_mlp_params(key, sizes, dtype=jnp.float32):
    """Mimics nn.Linear default U(-1/sqrt(fan_in), 1/sqrt(fan_in)) init.
    Weights stored [in, out]; biases stored [1, out]."""
    params = []
    for j in range(len(sizes) - 1):
        fan_in, fan_out = sizes[j], sizes[j + 1]
        key, kw, kb = jax.random.split(key, 3)
        bound = 1.0 / (fan_in ** 0.5)
        w = jax.random.uniform(kw, (fan_in, fan_out), dtype, -bound, bound)
        b = jax.random.uniform(kb, (1, fan_out), dtype, -bound, bound)
        params.append((w, b))
    return params, key


def _block_diag(a, b):
    za = jnp.zeros((a.shape[0], b.shape[1]), a.dtype)
    zb = jnp.zeros((b.shape[0], a.shape[1]), b.dtype)
    return jnp.concatenate(
        [jnp.concatenate([a, za], axis=1),
         jnp.concatenate([zb, b], axis=1)], axis=0)


def pack_affine_params(f_params, g_params, state_dim, num_action,
                       weight_dtype=jnp.bfloat16):
    """Pack f/g MLP params into fused weights for both kernels.

    Layer 1 shares the input -> concat along out ([S, 2H]); later layers are
    block-diagonal.  The last layer's output columns are zero-padded to a
    multiple of 128 (lane-dense stores).  The dynamics variant permutes the
    g columns a-major so gu is an unrolled loop of contiguous multiply-adds.
    Biases stay f32 (v5e has no bf16 VPU path); weights default to bf16
    (v6e/v7x MXU; on v7x do NOT go below bf16 — fp8 is not a drop-in).
    """
    S, A = state_dim, num_action
    n = len(f_params)
    out_raw = S + S * A
    fg_width = _round_up(out_raw, 128)
    dyn_width = _round_up(2 * S, 128)

    shared = []
    for layer in range(n - 1):
        (wf, bf), (wg, bg) = f_params[layer], g_params[layer]
        w = (jnp.concatenate([wf, wg], axis=1) if layer == 0
             else _block_diag(wf, wg))
        b = jnp.concatenate([bf, bg], axis=1)
        shared += [w.astype(weight_dtype), b.astype(jnp.float32)]

    (wf, bf), (wg, bg) = f_params[n - 1], g_params[n - 1]
    # a-major permutation: new column a*S + s holds original column s*A + a.
    perm = jnp.array([s * A + a for a in range(A) for s in range(S)],
                     dtype=jnp.int32)

    def last_layer(wg_, bg_):
        w = _block_diag(wf, wg_)                      # [2H, S + S*A]
        b = jnp.concatenate([bf, bg_], axis=1)        # [1,  S + S*A]
        pad = fg_width - out_raw
        w = jnp.pad(w, ((0, 0), (0, pad)))
        b = jnp.pad(b, ((0, 0), (0, pad)))
        return [w.astype(weight_dtype), b.astype(jnp.float32)]

    packed_fwd = tuple(shared + last_layer(wg, bg))              # g (s,a)-order
    packed_dyn = tuple(shared + last_layer(wg[:, perm], bg[:, perm]))  # a-major
    return packed_fwd, packed_dyn, fg_width, dyn_width


# ---------------------------------------------------------------------------
# Module port
# ---------------------------------------------------------------------------
class AffineDynamicsPallas:
    """JAX/Pallas port of AffineDynamics (forward / forward_x_dot / forward_next_state)."""

    def __init__(self, num_action, state_dim, hidden_dim=64, num_layers=3,
                 dt=0.1, key=None, weight_dtype=jnp.bfloat16, batch_block=512):
        if key is None:
            key = jax.random.PRNGKey(0)
        self.num_action = num_action
        self.state_dim = state_dim
        self.hidden_dim = hidden_dim
        self.num_layers = num_layers
        self.dt = dt

        f_sizes = [state_dim] + num_layers * [hidden_dim] + [state_dim]
        g_sizes = [state_dim] + num_layers * [hidden_dim] + [state_dim * num_action]
        self.f_params, key = init_mlp_params(key, f_sizes)
        self.g_params, key = init_mlp_params(key, g_sizes)

        (self.packed_fwd, self.packed_dyn,
         self._fg_width, self._dyn_width) = pack_affine_params(
            self.f_params, self.g_params, state_dim, num_action, weight_dtype)

        S, A, DT, BB = state_dim, num_action, dt, batch_block
        FGW, DW = self._fg_width, self._dyn_width
        self._forward_jit = jax.jit(
            lambda packed, state: fused_fg_forward(state, packed, S, A, FGW, BB))
        self._dynamics_jit = jax.jit(
            lambda packed, state, action: fused_dynamics(
                state, action, packed, S, A, DT, DW, BB))

    def forward(self, state):
        return self._forward_jit(self.packed_fwd, state)

    def forward_x_dot(self, state, action):
        x_dot, _ = self._dynamics_jit(self.packed_dyn, state, action)
        return x_dot

    def forward_next_state(self, state, action):
        _, nxt = self._dynamics_jit(self.packed_dyn, state, action)
        return nxt


# ---------------------------------------------------------------------------
# Pure-JAX reference for validation.
# ---------------------------------------------------------------------------
def mlp_ref(x, params):
    h = x.astype(jnp.float32)
    for i, (w, b) in enumerate(params):
        h = h @ w.astype(jnp.float32) + b.astype(jnp.float32)
        if i < len(params) - 1:
            h = jnp.maximum(h, 0.0)
    return h


def _check_model(model, state, action, atol, rtol):
    B, S, A = state.shape[0], model.state_dim, model.num_action
    f_out, g_out = model.forward(state)
    jax.block_until_ready((f_out, g_out))
    f_ref = mlp_ref(state, model.f_params)
    g_ref = mlp_ref(state, model.g_params)
    assert f_out.shape == (B, S)
    assert g_out.shape == (B, S * A)
    assert jnp.allclose(f_out, f_ref, atol=atol, rtol=rtol)
    assert jnp.allclose(g_out, g_ref, atol=atol, rtol=rtol)

    x_dot = jax.block_until_ready(model.forward_x_dot(state, action))
    nxt = jax.block_until_ready(model.forward_next_state(state, action))
    gu_ref = jnp.einsum('bsa,ba->bs', g_ref.reshape(B, S, A), action)
    xdot_ref = f_ref + gu_ref
    next_ref = xdot_ref * model.dt + state
    assert jnp.allclose(x_dot, xdot_ref, atol=atol, rtol=rtol)
    assert jnp.allclose(nxt, next_ref, atol=atol, rtol=rtol)


if __name__ == "__main__":
    num_action = 2
    state_dim = 4
    hidden_dim = 32

    key = jax.random.PRNGKey(0)
    kx, ka, kb, kc = jax.random.split(key, 4)

    # --- f32-weight model: tight numerical check (small batch, ragged batch,
    #     and a large batch that exercises the multi-step "parallel" grid). ---
    model_f32 = AffineDynamicsPallas(
        num_action=num_action, state_dim=state_dim, hidden_dim=hidden_dim,
        num_layers=3, dt=0.1, key=jax.random.PRNGKey(0),
        weight_dtype=jnp.float32)

    state = jax.random.normal(kx, (2, state_dim), jnp.float32)
    action = jax.random.normal(ka, (2, num_action), jnp.float32)
    _check_model(model_f32, state, action, atol=1e-4, rtol=1e-4)

    state_rag = jax.random.normal(kb, (100, state_dim), jnp.float32)
    action_rag = jax.random.normal(kb, (100, num_action), jnp.float32)
    _check_model(model_f32, state_rag, action_rag, atol=1e-4, rtol=1e-4)

    state_big = jax.random.normal(kc, (256, state_dim), jnp.float32)
    action_big = jax.random.normal(kc, (256, num_action), jnp.float32)
    _check_model(model_f32, state_big, action_big, atol=1e-4, rtol=1e-4)

    # --- default (bf16-weight) model: loose numerical check. ---
    model_bf16 = AffineDynamicsPallas(
        num_action=num_action, state_dim=state_dim, hidden_dim=hidden_dim,
        num_layers=3, dt=0.1, key=jax.random.PRNGKey(0))
    _check_model(model_bf16, state, action, atol=5e-2, rtol=5e-2)
    _check_model(model_bf16, state_big, action_big, atol=5e-2, rtol=5e-2)

    print("KERNEL_OK")
</pallas_src>

<mosaic_0001>
module attributes {stable_mosaic.version = 11 : i64} {
  func.func @_fg_kernel(%arg0: i32, %arg1: memref<8x4xf32, #tpu.memory_space<vmem>>, %arg2: memref<4x64xf32, #tpu.memory_space<vmem>>, %arg3: memref<1x64xf32, #tpu.memory_space<vmem>>, %arg4: memref<64x64xf32, #tpu.memory_space<vmem>>, %arg5: memref<1x64xf32, #tpu.memory_space<vmem>>, %arg6: memref<64x64xf32, #tpu.memory_space<vmem>>, %arg7: memref<1x64xf32, #tpu.memory_space<vmem>>, %arg8: memref<64x128xf32, #tpu.memory_space<vmem>>, %arg9: memref<1x128xf32, #tpu.memory_space<vmem>>, %arg10: memref<8x128xf32, #tpu.memory_space<vmem>>) attributes {dimension_semantics = [#tpu.dimension_semantics<parallel>], iteration_bounds = array<i64: 1>, scalar_prefetch = 0 : i64, scratch_operands = 0 : i64, tpu.core_type = #tpu.core_type<tc>, window_params = [{transform_indices = @transform_0, window_bounds = array<i64: 8, 4>}, {pipeline_mode = #tpu.pipeline_mode<synchronous>, transform_indices = @transform_1, window_bounds = array<i64: 4, 64>}, {pipeline_mode = #tpu.pipeline_mode<synchronous>, transform_indices = @transform_2, window_bounds = array<i64: 1, 64>}, {pipeline_mode = #tpu.pipeline_mode<synchronous>, transform_indices = @transform_3, window_bounds = array<i64: 64, 64>}, {pipeline_mode = #tpu.pipeline_mode<synchronous>, transform_indices = @transform_4, window_bounds = array<i64: 1, 64>}, {pipeline_mode = #tpu.pipeline_mode<synchronous>, transform_indices = @transform_5, window_bounds = array<i64: 64, 64>}, {pipeline_mode = #tpu.pipeline_mode<synchronous>, transform_indices = @transform_6, window_bounds = array<i64: 1, 64>}, {pipeline_mode = #tpu.pipeline_mode<synchronous>, transform_indices = @transform_7, window_bounds = array<i64: 64, 128>}, {pipeline_mode = #tpu.pipeline_mode<synchronous>, transform_indices = @transform_8, window_bounds = array<i64: 1, 128>}, {transform_indices = @transform_9, window_bounds = array<i64: 8, 128>}]} {
    %c0 = arith.constant 0 : index
    %c0_0 = arith.constant 0 : index
    %0 = vector.load %arg1[%c0, %c0_0] : memref<8x4xf32, #tpu.memory_space<vmem>>, vector<8x4xf32>
    %c0_1 = arith.constant 0 : index
    %c0_2 = arith.constant 0 : index
    %1 = vector.load %arg2[%c0_1, %c0_2] : memref<4x64xf32, #tpu.memory_space<vmem>>, vector<4x64xf32>
    %cst = arith.constant dense<0.000000e+00> : vector<8x64xf32>
    %2 = tpu.matmul %0, %1, %cst {dimension_numbers = #tpu.dot_dimension_numbers<[1], [0], [0], [1], [0, 0, 1, 1], [], []>} : vector<8x4xf32>, vector<4x64xf32>, vector<8x64xf32> -> vector<8x64xf32>
    %c0_3 = arith.constant 0 : index
    %c0_4 = arith.constant 0 : index
    %3 = vector.load %arg3[%c0_3, %c0_4] : memref<1x64xf32, #tpu.memory_space<vmem>>, vector<1x64xf32>
    %4 = vector.broadcast %3 : vector<1x64xf32> to vector<8x64xf32>
    %5 = arith.addf %2, %4 : vector<8x64xf32>
    %cst_5 = arith.constant 0.000000e+00 : f32
    %6 = vector.broadcast %cst_5 : f32 to vector<8x64xf32>
    %7 = arith.maximumf %5, %6 : vector<8x64xf32>
    %c0_6 = arith.constant 0 : index
    %c0_7 = arith.constant 0 : index
    %8 = vector.load %arg4[%c0_6, %c0_7] : memref<64x64xf32, #tpu.memory_space<vmem>>, vector<64x64xf32>
    %cst_8 = arith.constant dense<0.000000e+00> : vector<8x64xf32>
    %9 = tpu.matmul %7, %8, %cst_8 {dimension_numbers = #tpu.dot_dimension_numbers<[1], [0], [0], [1], [0, 0, 1, 1], [], []>} : vector<8x64xf32>, vector<64x64xf32>, vector<8x64xf32> -> vector<8x64xf32>
    %c0_9 = arith.constant 0 : index
    %c0_10 = arith.constant 0 : index
    %10 = vector.load %arg5[%c0_9, %c0_10] : memref<1x64xf32, #tpu.memory_space<vmem>>, vector<1x64xf32>
    %11 = vector.broadcast %10 : vector<1x64xf32> to vector<8x64xf32>
    %12 = arith.addf %9, %11 : vector<8x64xf32>
    %cst_11 = arith.constant 0.000000e+00 : f32
    %13 = vector.broadcast %cst_11 : f32 to vector<8x64xf32>
    %14 = arith.maximumf %12, %13 : vector<8x64xf32>
    %c0_12 = arith.constant 0 : index
    %c0_13 = arith.constant 0 : index
    %15 = vector.load %arg6[%c0_12, %c0_13] : memref<64x64xf32, #tpu.memory_space<vmem>>, vector<64x64xf32>
    %cst_14 = arith.constant dense<0.000000e+00> : vector<8x64xf32>
    %16 = tpu.matmul %14, %15, %cst_14 {dimension_numbers = #tpu.dot_dimension_numbers<[1], [0], [0], [1], [0, 0, 1, 1], [], []>} : vector<8x64xf32>, vector<64x64xf32>, vector<8x64xf32> -> vector<8x64xf32>
    %c0_15 = arith.constant 0 : index
    %c0_16 = arith.constant 0 : index
    %17 = vector.load %arg7[%c0_15, %c0_16] : memref<1x64xf32, #tpu.memory_space<vmem>>, vector<1x64xf32>
    %18 = vector.broadcast %17 : vector<1x64xf32> to vector<8x64xf32>
    %19 = arith.addf %16, %18 : vector<8x64xf32>
    %cst_17 = arith.constant 0.000000e+00 : f32
    %20 = vector.broadcast %cst_17 : f32 to vector<8x64xf32>
    %21 = arith.maximumf %19, %20 : vector<8x64xf32>
    %c0_18 = arith.constant 0 : index
    %c0_19 = arith.constant 0 : index
    %22 = vector.load %arg8[%c0_18, %c0_19] : memref<64x128xf32, #tpu.memory_space<vmem>>, vector<64x128xf32>
    %cst_20 = arith.constant dense<0.000000e+00> : vector<8x128xf32>
    %23 = tpu.matmul %21, %22, %cst_20 {dimension_numbers = #tpu.dot_dimension_numbers<[1], [0], [0], [1], [0, 0, 1, 1], [], []>} : vector<8x64xf32>, vector<64x128xf32>, vector<8x128xf32> -> vector<8x128xf32>
    %c0_21 = arith.constant 0 : index
    %c0_22 = arith.constant 0 : index
    %24 = vector.load %arg9[%c0_21, %c0_22] : memref<1x128xf32, #tpu.memory_space<vmem>>, vector<1x128xf32>
    %25 = vector.broadcast %24 : vector<1x128xf32> to vector<8x128xf32>
    %26 = arith.addf %23, %25 : vector<8x128xf32>
    %c0_23 = arith.constant 0 : index
    %c0_24 = arith.constant 0 : index
    %27 = vector.load %arg10[%c0_23, %c0_24] : memref<8x128xf32, #tpu.memory_space<vmem>>, vector<8x128xf32>
    tpu.vector_store %arg10[%c0_23, %c0_24], %26 {strides = array<i32>} : memref<8x128xf32, #tpu.memory_space<vmem>>, vector<8x128xf32>,
    return
  }
  func.func @transform_0(%arg0: i32) -> (i32, i32) {
    %c0_i32 = arith.constant 0 : i32
    %c0_i32_0 = arith.constant 0 : i32
    return %arg0, %c0_i32 : i32, i32
  }
  func.func @transform_1(%arg0: i32) -> (i32, i32) {
    %c0_i32 = arith.constant 0 : i32
    %c0_i32_0 = arith.constant 0 : i32
    %c0_i32_1 = arith.constant 0 : i32
    return %c0_i32, %c0_i32_0 : i32, i32
  }
  func.func @transform_2(%arg0: i32) -> (i32, i32) {
    %c0_i32 = arith.constant 0 : i32
    %c0_i32_0 = arith.constant 0 : i32
    %c0_i32_1 = arith.constant 0 : i32
    return %c0_i32, %c0_i32_0 : i32, i32
  }
  func.func @transform_3(%arg0: i32) -> (i32, i32) {
    %c0_i32 = arith.constant 0 : i32
    %c0_i32_0 = arith.constant 0 : i32
    %c0_i32_1 = arith.constant 0 : i32
    return %c0_i32, %c0_i32_0 : i32, i32
  }
  func.func @transform_4(%arg0: i32) -> (i32, i32) {
    %c0_i32 = arith.constant 0 : i32
    %c0_i32_0 = arith.constant 0 : i32
    %c0_i32_1 = arith.constant 0 : i32
    return %c0_i32, %c0_i32_0 : i32, i32
  }
  func.func @transform_5(%arg0: i32) -> (i32, i32) {
    %c0_i32 = arith.constant 0 : i32
    %c0_i32_0 = arith.constant 0 : i32
    %c0_i32_1 = arith.constant 0 : i32
    return %c0_i32, %c0_i32_0 : i32, i32
  }
  func.func @transform_6(%arg0: i32) -> (i32, i32) {
    %c0_i32 = arith.constant 0 : i32
    %c0_i32_0 = arith.constant 0 : i32
    %c0_i32_1 = arith.constant 0 : i32
    return %c0_i32, %c0_i32_0 : i32, i32
  }
  func.func @transform_7(%arg0: i32) -> (i32, i32) {
    %c0_i32 = arith.constant 0 : i32
    %c0_i32_0 = arith.constant 0 : i32
    %c0_i32_1 = arith.constant 0 : i32
    return %c0_i32, %c0_i32_0 : i32, i32
  }
  func.func @transform_8(%arg0: i32) -> (i32, i32) {
    %c0_i32 = arith.constant 0 : i32
    %c0_i32_0 = arith.constant 0 : i32
    %c0_i32_1 = arith.constant 0 : i32
    return %c0_i32, %c0_i32_0 : i32, i32
  }
  func.func @transform_9(%arg0: i32) -> (i32, i32) {
    %c0_i32 = arith.constant 0 : i32
    %c0_i32_0 = arith.constant 0 : i32
    return %arg0, %c0_i32 : i32, i32
  }
}

</mosaic_0001>

<bundles_post_ra>
// kernel: _lambda_.1
= control target key start
LH: loop header
LB: loop body
LE: loop exit
PB: predicated region body
PF: predicated region fallthrough
CT: control target
= control target key end

     0   :  { %14 = vsyncpa [#allocation3], 0  ;;  %s729_s0 = inlined_call_operand.vmem [shape: f32[8,4], index: 0, kind: input, shape index: {}]   ;;  %s730_s1 = inlined_call_operand.vmem [shape: f32[4,64], index: 1, kind: input, shape index: {}]   ;;  %s731_s2 = inlined_call_operand.vmem [shape: f32[1,64], index: 2, kind: input, shape index: {}]   ;;  %s732_s3 = inlined_call_operand.hbm [shape: f32[64,64], index: 3, kind: input, shape index: {}]   ;;  %s733_s4 = inlined_call_operand.vmem [shape: f32[1,64], index: 4, kind: input, shape index: {}]   ;;  %s734_s5 = inlined_call_operand.hbm [shape: f32[64,64], index: 5, kind: input, shape index: {}]   ;;  %s735_s6 = inlined_call_operand.vmem [shape: f32[1,64], index: 6, kind: input, shape index: {}]   ;;  %s736_s7 = inlined_call_operand.hbm [shape: f32[64,128], index: 7, kind: input, shape index: {}]   ;;  %s737_s8 = inlined_call_operand.vmem [shape: f32[1,128], index: 8, kind: input, shape index: {}]   ;;  %s738_s9 = inlined_call_operand.vmem [shape: f32[8,128], index: 9, kind: output, shape index: {}]  }
   0x1   :  { %15 = vsyncpa [#allocation5], 0  ;;  %s606_s30 = smov [#allocation4]   ;;  %s607_s11 = smov [#allocation2]  }
   0x2   :  { %s41_s10 = sshll.u32 %s606_s30, 4  ;;  %s27_s12 = sshll.u32 %s607_s11, 4  ;;  %s42_s10 = int_to_ptr.vmem [resolvable:$true] %s41_s10  ;;  %s28_s12 = int_to_ptr.vmem [resolvable:$true] %s27_s12 }
   0x3   :  { %s550_s13 = scalar_lea.vmem %s42_s10, 1024  ;;  %p555_p1 = scmp.lt.s32.totalorder %s42_s10, %s42_s10 }
   0x4   :  { %p551_p0 = scmp.ne.s32.totalorder %s42_s10, %s550_s13  ;;  %p556_p2 = scmp.lt.s32.totalorder %s550_s13, %s550_s13 }
   0x6   :  { %p557_p3 = por %p556_p2, %p555_p1 }
   0x8   :  { %p558_p4 = pnand %p557_p3, %p551_p0 }
   0xa   :  { %561 = shalt.err (!%p558_p4)
}
   0xb   :  { %s608_s14 = smov 128   ;;  %s609_s15 = smov 8  }
   0xc   :  { %47 = dma.hbm_to_vmem [thread:$0]  %s734_s5, 1024, %s42_s10, [#allocation5], %s608_s14, %s608_s14, %s609_s15  }
   0xd   :  { %s570_s18 = scalar_lea.vmem %s28_s12, 1024  ;;  %p575_p6 = scmp.lt.s32.totalorder %s28_s12, %s28_s12 }
   0xe   :  { %p571_p5 = scmp.ne.s32.totalorder %s28_s12, %s570_s18  ;;  %p576_p7 = scmp.lt.s32.totalorder %s570_s18, %s570_s18 }
  0x10   :  { %p577_p8 = por %p576_p7, %p575_p6 }
  0x12   :  { %p578_p9 = pnand %p577_p8, %p571_p5 }
  0x14   :  { %581 = shalt.err (!%p578_p9)
}
  0x15   :  { %33 = dma.hbm_to_vmem [thread:$0]  %s732_s3, 1024, %s28_s12, [#allocation3], %s608_s14, %s608_s14, %s609_s15  }
  0x16   :  { %s610_s21 = smov [#allocation6]  }
  0x17   :  { %s55_s22 = sshll.u32 %s610_s21, 4  ;;  %s56_s22 = int_to_ptr.vmem [resolvable:$true] %s55_s22 }
  0x18   :  { %s590_s23 = scalar_lea.vmem %s56_s22, 1024  ;;  %p595_p11 = scmp.lt.s32.totalorder %s56_s22, %s56_s22 }
  0x19   :  { %p591_p10 = scmp.ne.s32.totalorder %s56_s22, %s590_s23  ;;  %p596_p12 = scmp.lt.s32.totalorder %s590_s23, %s590_s23 }
  0x1b   :  { %p597_p13 = por %p596_p12, %p595_p11 }
  0x1d   :  { %p598_p0 = pnand %p597_p13, %p591_p10 }
  0x1f   :  { %601 = shalt.err (!%p598_p0)
}
  0x20   :  { %61 = dma.hbm_to_vmem [thread:$0]  %s736_s7, 1024, %s56_s22, [#allocation5], %s608_s14, %s608_s14, %s609_s15  }
  0x21   :  { %602 = dma.done.wait [#allocation3], 1024  }
  0x22   :  { %603 = vsyncadd [#allocation3], 4294966272 }
  0x23   :  { %604 = dma.done.wait [#allocation5], 2048  }
  0x24   :  { %605 = vsyncadd [#allocation5], 4294965248  ;;  %v611_v0 = vmov 0.0   ;;  %vm612_vm0 = vmmov 0   ;;  %vm86_vm1 = vcmask 1043456   ;;  %vm82_vm2 = vcmask 31744  }
  0x25   :  { %473 = vmatprep.subr.mxu0 %v611_v0  ;;  %475 = vmatprep.mubr.msk.f32.mxu0 %vm612_vm0, %v611_v0  ;;  %v74_v1 = vld [vmem:[%s730_s1] sm:$0xf]  ;;  %v168_v3 = vld [vmem:[#allocation2 + $0x38] sm:$0xff]  ;;  %v167_v4 = vld [vmem:[#allocation2 + $0x30] sm:$0xff]  ;;  %vm176_vm3 = vcmask 523264  }
  0x26   :  { %478 = vmatprep.subr.mxu1 %v611_v0  ;;  %494 = vmatprep.mubr.msk.f32.mxu1 %vm612_vm0, %v611_v0  ;;  %v73_v2 = vld [vmem:[%s729_s0] sm:$0xff]  ;;  %v166_v5 = vld [vmem:[#allocation2 + $0x28] sm:$0xff]  ;;  %v164_v7 = vld [vmem:[#allocation2 + $0x18] sm:$0xff] }
  0x27   :  { %474 = vmatpush3.msk.msra.mxu0 %vm86_vm1, %v74_v1  ;;  %479 = vmatpush3.msra.mxu1 %v168_v3  ;;  %v165_v6 = vld [vmem:[#allocation2 + $0x20] sm:$0xff]  ;;  %v163_v8 = vld [vmem:[#allocation2 + $0x10] sm:$0xff]  ;;  %v162_v9 = vld [vmem:[#allocation2 + $0x8] sm:$0xff] }
  0x28   :  { %476 = vmatmul.mubr.msk.f32.vlgmr.msra.gmra.mxu0 %vm82_vm2, %v73_v2  ;;  %480 = vmatprep.subr.mxu1 %v611_v0  ;;  %v161_v10 = vld [vmem:[#allocation2] sm:$0xff]  ;;  %v258_v11 = vld [vmem:[#allocation4 + $0x38] sm:$0xff]  ;;  %v257_v12 = vld [vmem:[#allocation4 + $0x30] sm:$0xff] }
  0x29   :  { %481 = vmatpush3.msra.mxu1 %v167_v4  ;;  %497 = vmatprep.subr.mxu0 %v611_v0  ;;  %v256_v13 = vld [vmem:[#allocation4 + $0x28] sm:$0xff]  ;;  %v255_v14 = vld [vmem:[#allocation4 + $0x20] sm:$0xff]  ;;  %v254_v15 = vld [vmem:[#allocation4 + $0x18] sm:$0xff] }
  0x2a   :  { %482 = vmatprep.subr.mxu1 %v611_v0  ;;  %513 = vmatprep.mubr.msk.f32.mxu0 %vm612_vm0, %v611_v0  ;;  %v435_v16 = vld [vmem:[%s731_s2] ss:$0 sm:$0xff]  ;;  %v253_v21 = vld [vmem:[#allocation4 + $0x10] sm:$0xff]  ;;  %v252_v22 = vld [vmem:[#allocation4 + $0x8] sm:$0xff] }
  0x2b   :  { %483 = vmatpush3.msra.mxu1 %v166_v5  ;;  %498 = vmatpush3.msra.mxu0 %v258_v11  ;;  %v251_v23 = vld [vmem:[#allocation4] sm:$0xff]  ;;  %v347_v24 = vld [vmem:[#allocation6 + $0x38] sm:$0xff]  ;;  %v346_v25 = vld [vmem:[#allocation6 + $0x30] sm:$0xff] }
  0x2c   :  { %484 = vmatprep.subr.mxu1 %v611_v0  ;;  %499 = vmatprep.subr.mxu0 %v611_v0  ;;  %v345_v26 = vld [vmem:[#allocation6 + $0x28] sm:$0xff]  ;;  %v344_v27 = vld [vmem:[#allocation6 + $0x20] sm:$0xff]  ;;  %v343_v28 = vld [vmem:[#allocation6 + $0x18] sm:$0xff] }
  0x2d   :  { %485 = vmatpush3.msra.mxu1 %v165_v6  ;;  %500 = vmatpush3.msra.mxu0 %v257_v12  ;;  %v438_v29 = vld [vmem:[%s733_s4] ss:$0 sm:$0xff]  ;;  %v342_v34 = vld [vmem:[#allocation6 + $0x10] sm:$0xff]  ;;  %v341_v35 = vld [vmem:[#allocation6 + $0x8] sm:$0xff] }
  0x2e   :  { %486 = vmatprep.subr.mxu1 %v611_v0  ;;  %501 = vmatprep.subr.mxu0 %v611_v0  ;;  %v340_v36 = vld [vmem:[#allocation6] sm:$0xff] }
  0x2f   :  { %487 = vmatpush3.msra.mxu1 %v164_v7  ;;  %502 = vmatpush3.msra.mxu0 %v256_v13  ;;  %v440_v37 = vld [vmem:[%s735_s6] ss:$0 sm:$0xff] }
  0x30   :  { %488 = vmatprep.subr.mxu1 %v611_v0  ;;  %503 = vmatprep.subr.mxu0 %v611_v0  ;;  %v442_v42 = vld [vmem:[%s737_s8] ss:$0 sm:$0xff] }
  0x31   :  { %489 = vmatpush3.msra.mxu1 %v163_v8  ;;  %504 = vmatpush3.msra.mxu0 %v255_v14 }
  0x32   :  { %490 = vmatprep.subr.mxu1 %v611_v0  ;;  %505 = vmatprep.subr.mxu0 %v611_v0 }
  0x33   :  { %491 = vmatpush3.msra.mxu1 %v162_v9  ;;  %506 = vmatpush3.msra.mxu0 %v254_v15 }
  0x34   :  { %492 = vmatprep.subr.mxu1 %v611_v0  ;;  %507 = vmatprep.subr.mxu0 %v611_v0 }
  0x35   :  { %493 = vmatpush3.msra.mxu1 %v161_v10  ;;  %508 = vmatpush3.msra.mxu0 %v253_v21 }
  0x36   :  { %516 = vmatprep.subr.mxu1 %v611_v0  ;;  %509 = vmatprep.subr.mxu0 %v611_v0 }
  0x37   :  { %510 = vmatpush3.msra.mxu0 %v252_v22 }
  0x38   :  { %511 = vmatprep.subr.mxu0 %v611_v0 }
  0x39   :  { %512 = vmatpush3.msra.mxu0 %v251_v23 }
  0xe8   :  { %v156_v17 = vpop.f32.mrf.mxu0 }
  0xe9   :  { %v157_v18 = vadd.f32 %v435_v16, %v156_v17 }
  0xea   :  { %v477_v19 = vpop.f32.mrf.mxu0 }
  0xeb   :  { %v160_v20 = vmax.f32 %v157_v18, 0.0 }
  0xed   :  { %495 = vmatmul.mubr.msk.f32.vlgmr.msra.gmra.mxu1 %vm176_vm3, %v160_v20 }
  0xee   :  { %532 = vmatprep.mubr.msk.f32.mxu1 %vm612_vm0, %v611_v0  ;;  %517 = vmatpush3.msra.mxu1 %v347_v24 }
  0xef   :  { %518 = vmatprep.subr.mxu1 %v611_v0 }
  0xf0   :  { %519 = vmatpush3.msra.mxu1 %v346_v25 }
  0xf1   :  { %520 = vmatprep.subr.mxu1 %v611_v0 }
  0xf2   :  { %521 = vmatpush3.msra.mxu1 %v345_v26 }
  0xf3   :  { %522 = vmatprep.subr.mxu1 %v611_v0 }
  0xf4   :  { %523 = vmatpush3.msra.mxu1 %v344_v27 }
  0xf5   :  { %524 = vmatprep.subr.mxu1 %v611_v0 }
  0xf6   :  { %525 = vmatpush3.msra.mxu1 %v343_v28 }
  0xf7   :  { %526 = vmatprep.subr.mxu1 %v611_v0 }
  0xf8   :  { %527 = vmatpush3.msra.mxu1 %v342_v34 }
  0xf9   :  { %528 = vmatprep.subr.mxu1 %v611_v0 }
  0xfa   :  { %529 = vmatpush3.msra.mxu1 %v341_v35 }
  0xfb   :  { %530 = vmatprep.subr.mxu1 %v611_v0 }
  0xfc   :  { %531 = vmatpush3.msra.mxu1 %v340_v36 }
 0x1ad   :  { %v246_v30 = vpop.f32.mrf.mxu1 }
 0x1ae   :  { %v247_v31 = vadd.f32 %v438_v29, %v246_v30 }
 0x1af   :  { %v496_v32 = vpop.f32.mrf.mxu1 }
 0x1b0   :  { %v250_v33 = vmax.f32 %v247_v31, 0.0 }
 0x1b2   :  { %514 = vmatmul.mubr.msk.f32.vlgmr.msra.gmra.mxu0 %vm176_vm3, %v250_v33 }
 0x272   :  { %v335_v38 = vpop.f32.mrf.mxu0 }
 0x273   :  { %v336_v39 = vadd.f32 %v440_v37, %v335_v38 }
 0x274   :  { %v515_v40 = vpop.f32.mrf.mxu0 }
 0x275   :  { %v339_v41 = vmax.f32 %v336_v39, 0.0 }
 0x277   :  { %533 = vmatmul.mubr.msk.f32.vlgmr.msra.gmra.mxu1 %vm176_vm3, %v339_v41 }
 0x337   :  { %v424_v43 = vpop.f32.mrf.mxu1 }
 0x338   :  { %v425_v44 = vadd.f32 %v442_v42, %v424_v43 }
 0x339   :  { %v534_v45 = vpop.f32.mrf.mxu1 }
 0x33a   :  { %428 = vst [vmem:[%s738_s9] sm:$0xff] %v425_v44 }
 0x33b   :  { %433 = vsyncpa [#allocation3], 1 }
 0x33c   :  { %434 = vsyncpa [#allocation5], 1 }

</bundles_post_ra>
